<compile_context>
chip_gen: v7x
topology: tpu7x:2x2x1
jax: 0.10.0
libtpu: 0.0.40
codegen_flags: <defaults>
</compile_context>

<pallas_src>
import functools

import jax
import jax.numpy as jnp
from jax.experimental import pallas as pl
from jax.experimental.pallas import tpu as pltpu


def _conv_mm_kernel(w_ref, x_ref, o_ref):
    # w_ref: (Cout, K)   flattened weight, K = KH*KW*Cin (resident across grid)
    # x_ref: (K, tc)     im2col patch columns for this block of output pixels
    # o_ref: (Cout, tc)  lane-dense output tile (tc is a multiple of 128)
    o_ref[...] = jnp.dot(
        w_ref[...], x_ref[...],
        preferred_element_type=jnp.float32).astype(o_ref.dtype)


def _im2col(x_nchw, KH, KW, padding):
    """(N, Cin, H, W) -> (KH*KW*Cin, N*Ho*Wo); rows ordered (kh, kw, c)."""
    N, Cin, H, W = x_nchw.shape
    H_out = H + 2 * padding - KH + 1
    W_out = W + 2 * padding - KW + 1
    x_pad = jnp.pad(
        x_nchw, ((0, 0), (0, 0), (padding, padding), (padding, padding)))
    taps = [x_pad[:, :, kh:kh + H_out, kw:kw + W_out]
            for kh in range(KH) for kw in range(KW)]       # each (N,Cin,Ho,Wo)
    x_mat = jnp.stack(taps, axis=0)                        # (KH*KW,N,Cin,Ho,Wo)
    x_mat = jnp.transpose(x_mat, (0, 2, 1, 3, 4))          # (KH*KW,Cin,N,Ho,Wo)
    return x_mat.reshape(KH * KW * Cin, N * H_out * W_out), H_out, W_out


@functools.partial(jax.jit, static_argnames=("padding",))
def conv2d_pallas(x_nchw, weight_oihw, padding=1):
    """Conv2d, stride=1, dilation=1, groups=1, bias=False.

    x_nchw:      (N, Cin, H, W)
    weight_oihw: (Cout, Cin, KH, KW)
    returns:     (N, Cout, H_out, W_out)  (same semantics as nn.Conv2d)
    """
    N, Cin, H, W = x_nchw.shape
    Cout, Cin_w, KH, KW = weight_oihw.shape
    assert Cin == Cin_w

    # Layout glue (fuses inside this jit, not the hot path): im2col + weight
    # flatten, done once instead of 9x per block inside the kernel.
    x_mat, H_out, W_out = _im2col(x_nchw, KH, KW, padding)      # (K, R)
    K = KH * KW * Cin
    R = N * H_out * W_out
    # weight[o, c, kh, kw] -> w_mat[o, (kh*KW + kw)*Cin + c]
    w_mat = jnp.transpose(weight_oihw, (0, 2, 3, 1)).reshape(Cout, K)

    # Column tile: lane-dense (multiple of 128) and VMEM-safe on all
    # generations.  At the test size R == 512, so the grid collapses to one
    # step; for bigger problems the parallel column axis shards across cores.
    if R % 512 == 0:
        tc = 512
    elif R % 128 == 0:
        tc = 128
    else:
        tc = R                      # fallback: single full-extent block
    grid = (R // tc,)

    out_mat = pl.pallas_call(
        _conv_mm_kernel,
        out_shape=jax.ShapeDtypeStruct((Cout, R), x_nchw.dtype),
        grid_spec=pltpu.PrefetchScalarGridSpec(
            num_scalar_prefetch=0,
            grid=grid,
            in_specs=[
                pl.BlockSpec((Cout, K), lambda j: (0, 0)),   # weight: resident
                pl.BlockSpec((K, tc), lambda j: (0, j)),     # patch columns
            ],
            out_specs=pl.BlockSpec((Cout, tc), lambda j: (0, j)),
        ),
        compiler_params=pltpu.CompilerParams(
            dimension_semantics=("parallel",)),
    )(w_mat, x_mat)

    # (Cout, N*Ho*Wo) -> (N, Cout, Ho, Wo)
    return jnp.transpose(out_mat.reshape(Cout, N, H_out, W_out), (1, 0, 2, 3))


if __name__ == "__main__":
    # Small shapes consistent with the module: inp=4, out=8, 3x3, pad=1.
    N, Cin, H, W = 2, 4, 16, 16
    Cout, KH, KW = 8, 3, 3

    key = jax.random.PRNGKey(0)
    kx, kw = jax.random.split(key)
    x = jax.random.normal(kx, (N, Cin, H, W), dtype=jnp.float32)
    # Deterministic weight matching nn.Conv2d's layout (Cout, Cin, KH, KW).
    weight = jax.random.normal(kw, (Cout, Cin, KH, KW), dtype=jnp.float32) * 0.1

    out = conv2d_pallas(x, weight, padding=1)
    out = jax.block_until_ready(out)

    # Cross-check against XLA's conv for correctness.
    ref = jax.lax.conv_general_dilated(
        x, weight, window_strides=(1, 1), padding=((1, 1), (1, 1)),
        dimension_numbers=("NCHW", "OIHW", "NCHW"))
    ref = jax.block_until_ready(ref)
    assert out.shape == (N, Cout, H, W)
    assert jnp.allclose(out, ref, atol=1e-4, rtol=1e-4)

    print("KERNEL_OK")
</pallas_src>

<mosaic_0001>
module attributes {stable_mosaic.version = 11 : i64} {
  func.func @_conv_mm_kernel(%arg0: i32, %arg1: memref<8x36xf32, #tpu.memory_space<vmem>>, %arg2: memref<36x512xf32, #tpu.memory_space<vmem>>, %arg3: memref<8x512xf32, #tpu.memory_space<vmem>>) attributes {dimension_semantics = [#tpu.dimension_semantics<parallel>], iteration_bounds = array<i64: 1>, scalar_prefetch = 0 : i64, scratch_operands = 0 : i64, tpu.core_type = #tpu.core_type<tc>, window_params = [{pipeline_mode = #tpu.pipeline_mode<synchronous>, transform_indices = @transform_0, window_bounds = array<i64: 8, 36>}, {transform_indices = @transform_1, window_bounds = array<i64: 36, 512>}, {transform_indices = @transform_2, window_bounds = array<i64: 8, 512>}]} {
    %c0 = arith.constant 0 : index
    %c0_0 = arith.constant 0 : index
    %0 = vector.load %arg1[%c0, %c0_0] : memref<8x36xf32, #tpu.memory_space<vmem>>, vector<8x36xf32>
    %c0_1 = arith.constant 0 : index
    %c0_2 = arith.constant 0 : index
    %1 = vector.load %arg2[%c0_1, %c0_2] : memref<36x512xf32, #tpu.memory_space<vmem>>, vector<36x512xf32>
    %cst = arith.constant dense<0.000000e+00> : vector<8x512xf32>
    %2 = tpu.matmul %0, %1, %cst {dimension_numbers = #tpu.dot_dimension_numbers<[1], [0], [0], [1], [0, 0, 1, 1], [], []>} : vector<8x36xf32>, vector<36x512xf32>, vector<8x512xf32> -> vector<8x512xf32>
    %c0_3 = arith.constant 0 : index
    %c0_4 = arith.constant 0 : index
    %3 = vector.load %arg3[%c0_3, %c0_4] : memref<8x512xf32, #tpu.memory_space<vmem>>, vector<8x512xf32>
    tpu.vector_store %arg3[%c0_3, %c0_4], %2 {strides = array<i32>} : memref<8x512xf32, #tpu.memory_space<vmem>>, vector<8x512xf32>,
    return
  }
  func.func @transform_0(%arg0: i32) -> (i32, i32) {
    %c0_i32 = arith.constant 0 : i32
    %c0_i32_0 = arith.constant 0 : i32
    %c0_i32_1 = arith.constant 0 : i32
    return %c0_i32, %c0_i32_0 : i32, i32
  }
  func.func @transform_1(%arg0: i32) -> (i32, i32) {
    %c0_i32 = arith.constant 0 : i32
    %c0_i32_0 = arith.constant 0 : i32
    return %c0_i32, %arg0 : i32, i32
  }
  func.func @transform_2(%arg0: i32) -> (i32, i32) {
    %c0_i32 = arith.constant 0 : i32
    %c0_i32_0 = arith.constant 0 : i32
    return %c0_i32, %arg0 : i32, i32
  }
}

</mosaic_0001>

<bundles_post_ra>
// kernel: conv2d_pallas.1
= control target key start
LH: loop header
LB: loop body
LE: loop exit
PB: predicated region body
PF: predicated region fallthrough
CT: control target
= control target key end

     0   :  { %v222_v3 = vmov 0.0   ;;  %vm36_vm0 = vcmask 1043456   ;;  %vm32_vm1 = vcmask 293888   ;;  %s313_s1 = inlined_call_operand.vmem [shape: f32[36,512], index: 1, kind: input, shape index: {}]   ;;  %s314_s0 = inlined_call_operand.vmem [shape: f32[8,36], index: 0, kind: input, shape index: {}]   ;;  %s315_s2 = inlined_call_operand.vmem [shape: f32[8,512], index: 2, kind: output, shape index: {}]  }
   0x1   :  { %v13_v0 = vld [vmem:[%s313_s1 + $0x8] sm:$0xff]  ;;  %v15_v2 = vld [vmem:[%s313_s1 + $0x18] sm:$0xff]  ;;  %113 = vmatprep.mubr.f32.mxu0 %v222_v3  ;;  %184 = vmatprep.mubr.f32.mxu1 %v222_v3  ;;  %v12_v6 = vld [vmem:[%s313_s1] sm:$0xff] }
   0x2   :  { %v17_v1 = vld [vmem:[%s313_s1 + $0x28] sm:$0xff]  ;;  %v19_v5 = vld [vmem:[%s313_s1 + $0x38] sm:$0xff]  ;;  %v16_v7 = vld [vmem:[%s313_s1 + $0x20] sm:$0xff] }
   0x3   :  { %v205_v4 = vpack.c.bf16 %v17_v1, %v13_v0  ;;  %v213_v8 = vpack.c.bf16 %v19_v5, %v15_v2  ;;  %v207_v9 = vpack.c.bf16 %v16_v7, %v12_v6  ;;  %v14_v10 = vld [vmem:[%s313_s1 + $0x10] sm:$0xff]  ;;  %v21_v12 = vld [vmem:[%s313_s1 + $0x48] sm:$0xff]  ;;  %v23_v15 = vld [vmem:[%s313_s1 + $0x58] sm:$0xff] }
   0x4   :  { %v18_v11 = vld [vmem:[%s313_s1 + $0x30] sm:$0xff]  ;;  %v25_v14 = vld [vmem:[%s313_s1 + $0x68] sm:$0xff]  ;;  %v27_v16 = vld [vmem:[%s313_s1 + $0x78] sm:$0xff] }
   0x5   :  { %206 = vmatprep.subr.bf16.mxu0 %v205_v4  ;;  %v215_v13 = vpack.c.bf16 %v18_v11, %v14_v10  ;;  %214 = vmatprep.subr.bf16.mxu1 %v213_v8  ;;  %v209_v17 = vpack.c.bf16 %v25_v14, %v21_v12  ;;  %v217_v18 = vpack.c.bf16 %v27_v16, %v23_v15  ;;  %v20_v19 = vld [vmem:[%s313_s1 + $0x40] sm:$0xff]  ;;  %v22_v21 = vld [vmem:[%s313_s1 + $0x50] sm:$0xff]  ;;  %v29_v25 = vld [vmem:[%s313_s1 + $0x88] sm:$0xf] }
   0x6   :  { %208 = vmatpush1.bf16.msra.mxu0 %v207_v9  ;;  %v24_v20 = vld [vmem:[%s313_s1 + $0x60] sm:$0xff]  ;;  %v26_v23 = vld [vmem:[%s313_s1 + $0x70] sm:$0xff]  ;;  %v31_v26 = vld [vmem:[%s313_s1 + $0x98] sm:$0xf] }
   0x7   :  { %216 = vmatpush1.bf16.msra.mxu1 %v215_v13  ;;  %v211_v22 = vpack.c.bf16 %v24_v20, %v20_v19  ;;  %210 = vmatprep.subr.bf16.mxu0 %v209_v17  ;;  %v219_v24 = vpack.c.bf16 %v26_v23, %v22_v21  ;;  %v28_v27 = vld [vmem:[%s313_s1 + $0x80] sm:$0xf]  ;;  %v30_v28 = vld [vmem:[%s313_s1 + $0x90] sm:$0xf] }
   0x8   :  { %218 = vmatprep.subr.bf16.mxu1 %v217_v18  ;;  %v11_v29 = vld [vmem:[%s314_s0] sm:$0xff] }
   0xa   :  { %212 = vmatpush1.bf16.msra.mxu0 %v211_v22 }
   0xb   :  { %220 = vmatpush1.bf16.msra.mxu1 %v219_v24  ;;  %199 = vmatprep.subr.msk.mxu0 %vm36_vm0, %v29_v25 }
   0xc   :  { %202 = vmatprep.subr.msk.mxu1 %vm36_vm0, %v31_v26 }
   0xe   :  { %200 = vmatpush1.msk.msra.mxu0 %vm36_vm0, %v28_v27 }
   0xf   :  { %203 = vmatpush1.msk.msra.mxu1 %vm36_vm0, %v30_v28  ;;  %201 = vmatmul.mubr.msk.f32.vlgmr.msra.gmra.mrb[0].mxu0 %vm32_vm1, %v11_v29 }
  0x10   :  { %204 = vmatmul.mubr.msk.f32.vlgmr.msra.gmra.mrb[0].mxu1 %vm32_vm1, %v11_v29 }
  0xe2   :  { %v115_v30 = vpop.f32.mrb[0].mxu0 }
  0xe3   :  { %191 = vst [vmem:[%s315_s2] sm:$0xff] %v115_v30  ;;  %v186_v31 = vpop.f32.mrb[0].mxu1  ;;  %v117_v32 = vpop.f32.mrb[1].mxu0 }
  0xe4   :  { %193 = vst [vmem:[%s315_s2 + $0x10] sm:$0xff] %v186_v31  ;;  %192 = vst [vmem:[%s315_s2 + $0x8] sm:$0xff] %v117_v32  ;;  %v188_v33 = vpop.f32.mrb[1].mxu1 }
  0xe5   :  { %194 = vst [vmem:[%s315_s2 + $0x18] sm:$0xff] %v188_v33 }

</bundles_post_ra>
